<compile_context>
chip_gen: v6e
topology: v6e:2x2x1
jax: 0.10.0
libtpu: 0.0.40
codegen_flags: <defaults>
</compile_context>

<pallas_src>
import math

import jax
import jax.numpy as jnp
from jax.experimental import pallas as pl
from jax.experimental.pallas import tpu as pltpu


def _round_up(x, m):
    return ((x + m - 1) // m) * m


def _num_tensorcores():
    # v7x (and v4-style megacore parts) have 2 TensorCores a leading "parallel"
    # grid axis can shard across; v5e/v6e have one, so the extra axis would just
    # be a serial loop with extra padding granularity and duplicate slabs.
    try:
        kind = jax.devices()[0].device_kind.lower()
    except Exception:
        return 1
    return 2 if ("v7" in kind or "v4" in kind) else 1


def _make_kernel(*, TR, SR, C, chunks, n_rows, need_mask):
    n_strips = TR // SR

    def kernel(x_ref, t_ref, a_ref, b_ref, s_ref):
        i = pl.program_id(0)
        j = pl.program_id(1)

        @pl.when(j == 0)
        def _():
            a_ref[...] = jnp.zeros_like(a_ref)
            b_ref[...] = jnp.zeros_like(b_ref)
            s_ref[...] = jnp.zeros_like(s_ref)

        # Logical (unclamped) first row of this block; used for the tail mask.
        row0 = (i * chunks + j) * TR

        def do_strip(r0, masked):
            x = x_ref[pl.ds(r0, SR), :].astype(jnp.float32)   # (SR, C)
            t = t_ref[pl.ds(r0, SR), :].astype(jnp.float32)   # (SR, C)
            if masked:
                # (SR, 1) row mask broadcast over lanes; only boundary blocks
                # (and fully out-of-range clamped blocks) ever execute this.
                rows = row0 + r0 + jax.lax.broadcasted_iota(jnp.int32, (SR, 1), 0)
                keep = rows < n_rows
                x = jnp.where(keep, x, 0.0)
                t = jnp.where(keep, t, 0.0)
            # Numerically stable softplus(x) = max(x, 0) + log1p(exp(-|x|)).
            # TODO(synk): if a v7x profile shows EUP saturation (2 transcendentals
            # per element vs 3.2 TB/s HBM), evaluate exp(-|x|) in bf16.
            sp = jnp.maximum(x, 0.0) + jnp.log1p(jnp.exp(-jnp.abs(x)))
            if masked:
                sp = jnp.where(keep, sp, 0.0)

            a = t * (sp - x)        # contributes sum t*softplus(-x)
            b = (1.0 - t) * sp      # contributes sum (1-t)*softplus(x)

            def red(v):
                # (SR, C) -> (SR//8, 8, C); summing the leading axis is plain
                # vreg-group adds on the VPU (no per-strip cross-lane reduce).
                return jnp.sum(v.reshape(SR // 8, 8, C), axis=0)[None]

            a_ref[...] += red(a)
            b_ref[...] += red(b)
            s_ref[...] += red(t)

        def run(masked):
            if n_strips == 1:
                do_strip(0, masked)
            else:
                @pl.loop(0, n_strips)
                def _(s):
                    do_strip(pl.multiple_of(s * SR, SR), masked)

        if need_mask:
            not_boundary = row0 + TR <= n_rows

            @pl.when(not_boundary)
            def _():
                run(False)

            @pl.when(jnp.logical_not(not_boundary))
            def _():
                run(True)
        else:
            run(False)

    return kernel


def occ_bce_logits(logits, occ, *, block_rows=None, strip_rows=None,
                   max_block_rows=8192, num_cores=None):
    """Pallas implementation of OCCBCELogits.forward for (..., S, C) inputs."""
    shape = logits.shape
    assert occ.shape == shape
    assert len(shape) >= 2
    C = shape[-1]
    n_rows = int(math.prod(shape[:-1]))            # flattened leading rows
    assert n_rows > 0
    divisor = max(1, int(math.prod(shape[:-2])))   # .mean() over batch dims

    x2 = logits.reshape(n_rows, C)
    t2 = occ.reshape(n_rows, C)

    if num_cores is None:
        num_cores = _num_tensorcores()

    isx = jnp.dtype(logits.dtype).itemsize
    ist = jnp.dtype(occ.dtype).itemsize
    # Sublane packing multiple: 8 (f32), 16 (bf16), 32 (int8/fp8).
    sub = max(8, 32 // max(1, min(isx, ist)))

    # Strip rows: bound the per-strip f32 temporaries to ~1 MiB each.
    sr_cap = max(sub, ((1 << 20) // (C * 4)) // sub * sub)
    SR = max(sub, min(512, sr_cap, _round_up(n_rows, sub)))
    if strip_rows is not None:
        SR = max(sub, _round_up(min(strip_rows, _round_up(n_rows, sub)), sub))

    # Block rows: big lane-dense blocks, but keep the double-buffered input
    # windows (2 inputs x 2 buffers) under ~24 MiB so the kernel fits every
    # generation's VMEM (incl. v7x's 64 MiB).
    bytes_per_row = C * (isx + ist)
    tr_budget = max(SR, (24 * 1024 * 1024) // (2 * bytes_per_row))
    n_strips = max(1, min(tr_budget, max_block_rows, _round_up(n_rows, SR)) // SR)
    TR = SR * n_strips
    if block_rows is not None:
        TR = max(SR, _round_up(block_rows, SR))

    num_blocks = (n_rows + TR - 1) // TR
    chunks = (num_blocks + num_cores - 1) // num_cores
    total_blocks = num_cores * chunks
    # Mask only when the grid covers rows past n_rows (no wrapper-side pad).
    need_mask = (n_rows % TR != 0) or (total_blocks != num_blocks)
    need_clamp = total_blocks != num_blocks

    if need_clamp:
        last = num_blocks - 1

        def in_index(i, j):
            # Grid blocks past the end re-read the last valid block; their
            # contribution is zeroed by the in-kernel row mask.
            return (jnp.minimum(i * chunks + j, last), 0)
    else:
        def in_index(i, j):
            return (i * chunks + j, 0)

    kernel = _make_kernel(TR=TR, SR=SR, C=C, chunks=chunks,
                          n_rows=n_rows, need_mask=need_mask)

    out_struct = jax.ShapeDtypeStruct((num_cores, 8, C), jnp.float32)
    out_spec = pl.BlockSpec((1, 8, C), lambda i, j: (i, 0, 0))
    in_spec = pl.BlockSpec((TR, C), in_index)

    a, b, s = pl.pallas_call(
        kernel,
        out_shape=(out_struct,) * 3,
        grid_spec=pltpu.PrefetchScalarGridSpec(
            num_scalar_prefetch=0,
            grid=(num_cores, chunks),
            in_specs=[in_spec, in_spec],
            out_specs=(out_spec,) * 3,
        ),
        compiler_params=pltpu.CompilerParams(
            # TODO(synk): on v7x verify in the profile that axis 0 actually
            # shards across both TensorCores; otherwise switch it to
            # pltpu.CORE_PARALLEL (or pl.core_map over a tensorcore mesh).
            dimension_semantics=("parallel", "arbitrary"),
            vmem_limit_bytes=48 * 1024 * 1024,
        ),
    )(x2, t2)

    # Tiny epilogue (a few KiB of data) in plain JAX: per-channel combine.
    A = jnp.sum(a, axis=(0, 1))     # (C,) = sum t * softplus(-x)
    B = jnp.sum(b, axis=(0, 1))     # (C,) = sum (1-t) * softplus(x)
    T = jnp.sum(s, axis=(0, 1))     # (C,) = sum t
    eps = jnp.float32(1e-12)
    pw = (jnp.float32(n_rows) - T + eps) / (T + eps)
    total = jnp.sum(pw * A + B)
    return total / jnp.float32(divisor)


# Pure-JAX reference (mirrors the PyTorch math) for verification.
def _reference(logits, occ):
    x = logits.astype(jnp.float32)
    t = occ.astype(jnp.float32)
    C = t.shape[-1]
    t2 = t.reshape(-1, C)
    pw = (jnp.sum(1.0 - t2, axis=0) + 1e-12) / (jnp.sum(t2, axis=0) + 1e-12)
    sp_pos = jnp.maximum(x, 0.0) + jnp.log1p(jnp.exp(-jnp.abs(x)))
    sp_neg = sp_pos - x
    loss = pw * t * sp_neg + (1.0 - t) * sp_pos
    return jnp.mean(jnp.sum(loss, axis=(-1, -2)))


if __name__ == "__main__":
    key = jax.random.PRNGKey(0)

    cases = [
        # (shape, kwargs). Case 2 exercises the ragged-tail mask (no padding);
        # case 3 exercises multi-chunk accumulation + the strip loop + the
        # boundary-only mask at tiny block sizes.
        ((2, 16, 128), {}),
        ((3, 13, 128), {}),
        ((2, 100, 128), dict(block_rows=64, strip_rows=32)),
    ]
    for n, (shape, kw) in enumerate(cases):
        k1, k2 = jax.random.split(jax.random.fold_in(key, n))
        logits = jax.random.normal(k1, shape, dtype=jnp.float32)
        occ = jax.random.bernoulli(k2, p=0.3, shape=shape).astype(jnp.float32)

        out = jax.block_until_ready(occ_bce_logits(logits, occ, **kw))
        ref = _reference(logits, occ)
        assert jnp.allclose(out, ref, rtol=1e-4, atol=1e-3), (shape, out, ref)

    print("KERNEL_OK")
</pallas_src>

<mosaic_0001>
module attributes {stable_mosaic.version = 11 : i64} {
  func.func @kernel(%arg0: i32, %arg1: i32, %arg2: memref<32x128xf32, #tpu.memory_space<vmem>>, %arg3: memref<32x128xf32, #tpu.memory_space<vmem>>, %arg4: memref<1x8x128xf32, #tpu.memory_space<vmem>>, %arg5: memref<1x8x128xf32, #tpu.memory_space<vmem>>, %arg6: memref<1x8x128xf32, #tpu.memory_space<vmem>>) attributes {dimension_semantics = [#tpu.dimension_semantics<parallel>, #tpu.dimension_semantics<arbitrary>], iteration_bounds = array<i64: 1, 1>, scalar_prefetch = 0 : i64, scratch_operands = 0 : i64, tpu.core_type = #tpu.core_type<tc>, window_params = [{transform_indices = @transform_0, window_bounds = array<i64: 32, 128>}, {transform_indices = @transform_1, window_bounds = array<i64: 32, 128>}, {transform_indices = @transform_2, window_bounds = array<i64: 1, 8, 128>}, {transform_indices = @transform_3, window_bounds = array<i64: 1, 8, 128>}, {transform_indices = @transform_4, window_bounds = array<i64: 1, 8, 128>}]} {
    %c0_i32 = arith.constant 0 : i32
    %0 = arith.cmpi eq, %arg1, %c0_i32 : i32
    %1 = arith.extui %0 : i1 to i32
    %c0_i32_0 = arith.constant 0 : i32
    %2 = arith.cmpi ne, %1, %c0_i32_0 : i32
    scf.if %2 {
      %cst_27 = arith.constant 0.000000e+00 : f32
      %36 = vector.broadcast %cst_27 : f32 to vector<1x8x128xf32>
      %c0_28 = arith.constant 0 : index
      %c0_29 = arith.constant 0 : index
      %c0_30 = arith.constant 0 : index
      %37 = vector.load %arg4[%c0_28, %c0_29, %c0_30] : memref<1x8x128xf32, #tpu.memory_space<vmem>>, vector<1x8x128xf32>
      tpu.vector_store %arg4[%c0_28, %c0_29, %c0_30], %36 {strides = array<i32>} : memref<1x8x128xf32, #tpu.memory_space<vmem>>, vector<1x8x128xf32>,
      %cst_31 = arith.constant 0.000000e+00 : f32
      %38 = vector.broadcast %cst_31 : f32 to vector<1x8x128xf32>
      %c0_32 = arith.constant 0 : index
      %c0_33 = arith.constant 0 : index
      %c0_34 = arith.constant 0 : index
      %39 = vector.load %arg5[%c0_32, %c0_33, %c0_34] : memref<1x8x128xf32, #tpu.memory_space<vmem>>, vector<1x8x128xf32>
      tpu.vector_store %arg5[%c0_32, %c0_33, %c0_34], %38 {strides = array<i32>} : memref<1x8x128xf32, #tpu.memory_space<vmem>>, vector<1x8x128xf32>,
      %cst_35 = arith.constant 0.000000e+00 : f32
      %40 = vector.broadcast %cst_35 : f32 to vector<1x8x128xf32>
      %c0_36 = arith.constant 0 : index
      %c0_37 = arith.constant 0 : index
      %c0_38 = arith.constant 0 : index
      %41 = vector.load %arg6[%c0_36, %c0_37, %c0_38] : memref<1x8x128xf32, #tpu.memory_space<vmem>>, vector<1x8x128xf32>
      tpu.vector_store %arg6[%c0_36, %c0_37, %c0_38], %40 {strides = array<i32>} : memref<1x8x128xf32, #tpu.memory_space<vmem>>, vector<1x8x128xf32>,
    } else {
    }
    %c0 = arith.constant 0 : index
    %c0_1 = arith.constant 0 : index
    %3 = vector.load %arg2[%c0, %c0_1] : memref<32x128xf32, #tpu.memory_space<vmem>>, vector<32x128xf32>
    %c0_2 = arith.constant 0 : index
    %c0_3 = arith.constant 0 : index
    %4 = vector.load %arg3[%c0_2, %c0_3] : memref<32x128xf32, #tpu.memory_space<vmem>>, vector<32x128xf32>
    %cst = arith.constant 0.000000e+00 : f32
    %5 = vector.broadcast %cst : f32 to vector<32x128xf32>
    %6 = arith.maximumf %3, %5 : vector<32x128xf32>
    %7 = math.absf %3 : vector<32x128xf32>
    %cst_4 = arith.constant 0.000000e+00 : f32
    %8 = vector.broadcast %cst_4 : f32 to vector<32x128xf32>
    %9 = arith.subf %8, %7 : vector<32x128xf32>
    %10 = math.exp %9 : vector<32x128xf32>
    %11 = math.log1p %10 : vector<32x128xf32>
    %12 = arith.addf %6, %11 : vector<32x128xf32>
    %13 = arith.subf %12, %3 : vector<32x128xf32>
    %14 = arith.mulf %4, %13 : vector<32x128xf32>
    %cst_5 = arith.constant 1.000000e+00 : f32
    %15 = vector.broadcast %cst_5 : f32 to vector<32x128xf32>
    %16 = arith.subf %15, %4 : vector<32x128xf32>
    %17 = arith.mulf %16, %12 : vector<32x128xf32>
    %c0_6 = arith.constant 0 : index
    %c0_7 = arith.constant 0 : index
    %c0_8 = arith.constant 0 : index
    %18 = vector.load %arg4[%c0_6, %c0_7, %c0_8] : memref<1x8x128xf32, #tpu.memory_space<vmem>>, vector<1x8x128xf32>
    %19 = vector.shape_cast %14 : vector<32x128xf32> to vector<4x8x128xf32>
    %cst_9 = arith.constant dense<0.000000e+00> : vector<8x128xf32>
    %20 = vector.multi_reduction <add>, %19, %cst_9 [0] : vector<4x8x128xf32> to vector<8x128xf32>
    %21 = vector.shape_cast %20 : vector<8x128xf32> to vector<1x8x128xf32>
    %22 = arith.addf %18, %21 : vector<1x8x128xf32>
    %c0_10 = arith.constant 0 : index
    %c0_11 = arith.constant 0 : index
    %c0_12 = arith.constant 0 : index
    %23 = vector.load %arg4[%c0_10, %c0_11, %c0_12] : memref<1x8x128xf32, #tpu.memory_space<vmem>>, vector<1x8x128xf32>
    tpu.vector_store %arg4[%c0_10, %c0_11, %c0_12], %22 {strides = array<i32>} : memref<1x8x128xf32, #tpu.memory_space<vmem>>, vector<1x8x128xf32>,
    %c0_13 = arith.constant 0 : index
    %c0_14 = arith.constant 0 : index
    %c0_15 = arith.constant 0 : index
    %24 = vector.load %arg5[%c0_13, %c0_14, %c0_15] : memref<1x8x128xf32, #tpu.memory_space<vmem>>, vector<1x8x128xf32>
    %25 = vector.shape_cast %17 : vector<32x128xf32> to vector<4x8x128xf32>
    %cst_16 = arith.constant dense<0.000000e+00> : vector<8x128xf32>
    %26 = vector.multi_reduction <add>, %25, %cst_16 [0] : vector<4x8x128xf32> to vector<8x128xf32>
    %27 = vector.shape_cast %26 : vector<8x128xf32> to vector<1x8x128xf32>
    %28 = arith.addf %24, %27 : vector<1x8x128xf32>
    %c0_17 = arith.constant 0 : index
    %c0_18 = arith.constant 0 : index
    %c0_19 = arith.constant 0 : index
    %29 = vector.load %arg5[%c0_17, %c0_18, %c0_19] : memref<1x8x128xf32, #tpu.memory_space<vmem>>, vector<1x8x128xf32>
    tpu.vector_store %arg5[%c0_17, %c0_18, %c0_19], %28 {strides = array<i32>} : memref<1x8x128xf32, #tpu.memory_space<vmem>>, vector<1x8x128xf32>,
    %c0_20 = arith.constant 0 : index
    %c0_21 = arith.constant 0 : index
    %c0_22 = arith.constant 0 : index
    %30 = vector.load %arg6[%c0_20, %c0_21, %c0_22] : memref<1x8x128xf32, #tpu.memory_space<vmem>>, vector<1x8x128xf32>
    %31 = vector.shape_cast %4 : vector<32x128xf32> to vector<4x8x128xf32>
    %cst_23 = arith.constant dense<0.000000e+00> : vector<8x128xf32>
    %32 = vector.multi_reduction <add>, %31, %cst_23 [0] : vector<4x8x128xf32> to vector<8x128xf32>
    %33 = vector.shape_cast %32 : vector<8x128xf32> to vector<1x8x128xf32>
    %34 = arith.addf %30, %33 : vector<1x8x128xf32>
    %c0_24 = arith.constant 0 : index
    %c0_25 = arith.constant 0 : index
    %c0_26 = arith.constant 0 : index
    %35 = vector.load %arg6[%c0_24, %c0_25, %c0_26] : memref<1x8x128xf32, #tpu.memory_space<vmem>>, vector<1x8x128xf32>
    tpu.vector_store %arg6[%c0_24, %c0_25, %c0_26], %34 {strides = array<i32>} : memref<1x8x128xf32, #tpu.memory_space<vmem>>, vector<1x8x128xf32>,
    return
  }
  func.func @transform_0(%arg0: i32, %arg1: i32) -> (i32, i32) {
    %c1_i32 = arith.constant 1 : i32
    %0 = arith.muli %arg0, %c1_i32 : i32
    %1 = arith.addi %0, %arg1 : i32
    %c0_i32 = arith.constant 0 : i32
    %c0_i32_0 = arith.constant 0 : i32
    return %1, %c0_i32 : i32, i32
  }
  func.func @transform_1(%arg0: i32, %arg1: i32) -> (i32, i32) {
    %c1_i32 = arith.constant 1 : i32
    %0 = arith.muli %arg0, %c1_i32 : i32
    %1 = arith.addi %0, %arg1 : i32
    %c0_i32 = arith.constant 0 : i32
    %c0_i32_0 = arith.constant 0 : i32
    return %1, %c0_i32 : i32, i32
  }
  func.func @transform_2(%arg0: i32, %arg1: i32) -> (i32, i32, i32) {
    %c0_i32 = arith.constant 0 : i32
    %c0_i32_0 = arith.constant 0 : i32
    %c0_i32_1 = arith.constant 0 : i32
    return %arg0, %c0_i32, %c0_i32_0 : i32, i32, i32
  }
  func.func @transform_3(%arg0: i32, %arg1: i32) -> (i32, i32, i32) {
    %c0_i32 = arith.constant 0 : i32
    %c0_i32_0 = arith.constant 0 : i32
    %c0_i32_1 = arith.constant 0 : i32
    return %arg0, %c0_i32, %c0_i32_0 : i32, i32, i32
  }
  func.func @transform_4(%arg0: i32, %arg1: i32) -> (i32, i32, i32) {
    %c0_i32 = arith.constant 0 : i32
    %c0_i32_0 = arith.constant 0 : i32
    %c0_i32_1 = arith.constant 0 : i32
    return %arg0, %c0_i32, %c0_i32_0 : i32, i32, i32
  }
}

</mosaic_0001>

<bundles_post_ra>
// kernel: tpu_custom_call.1
= control target key start
LH: loop header
LB: loop body
LE: loop exit
PB: predicated region body
PF: predicated region fallthrough
CT: control target
= control target key end

     0   :  { %10 = vsyncpa [#allocation3], 0  ;;  %s439_s0 = inlined_call_operand.hbm [shape: f32[32,128], index: 0, kind: input, shape index: {}]   ;;  %s440_s1 = inlined_call_operand.hbm [shape: f32[32,128], index: 1, kind: input, shape index: {}]   ;;  %s441_s2 = inlined_call_operand.hbm [shape: f32[1,8,128], index: 2, kind: output, shape index: {0}]   ;;  %s442_s3 = inlined_call_operand.hbm [shape: f32[1,8,128], index: 3, kind: output, shape index: {1}]   ;;  %s443_s4 = inlined_call_operand.hbm [shape: f32[1,8,128], index: 4, kind: output, shape index: {2}]  }
   0x1   :  { %11 = vsyncpa [#allocation6], 0 }
   0x2   :  { %12 = vsyncpa [#allocation4], 0 }
   0x3   :  { %13 = vsyncpa [#allocation9], 0  ;;  %s340_s15 = smov [#allocation2]  }
   0x4   :  { %s23_s16 = sshll.u32 %s340_s15, 4  ;;  %s24_s16 = int_to_ptr.vmem [resolvable:$true] %s23_s16 }
   0x5   :  { %s240_s17 = scalar_lea.vmem %s24_s16, 512  ;;  %p245_p1 = scmp.lt.s32.totalorder %s24_s16, %s24_s16 }
   0x6   :  { %p241_p0 = scmp.ne.s32.totalorder %s24_s16, %s240_s17  ;;  %p246_p2 = scmp.lt.s32.totalorder %s240_s17, %s240_s17 }
   0x8   :  { %p247_p3 = por %p246_p2, %p245_p1 }
   0xa   :  { %p248_p4 = pnand %p247_p3, %p241_p0 }
   0xc   :  { %251 = shalt.err (!%p248_p4)
}
   0xd   :  { %s341_s18 = smov 128   ;;  %s342_s19 = smov 8  }
   0xe   :  { %29 = dma.hbm_to_vmem [thread:$0]  %s439_s0, 512, %s24_s16, [#allocation3], %s341_s18, %s341_s18, %s342_s19  }
   0xf   :  { %s343_s22 = smov [#allocation5]  }
  0x10   :  { %s39_s23 = sshll.u32 %s343_s22, 4  ;;  %s40_s23 = int_to_ptr.vmem [resolvable:$true] %s39_s23 }
  0x11   :  { %s260_s24 = scalar_lea.vmem %s40_s23, 512  ;;  %p265_p6 = scmp.lt.s32.totalorder %s40_s23, %s40_s23 }
  0x12   :  { %p261_p5 = scmp.ne.s32.totalorder %s40_s23, %s260_s24  ;;  %p266_p7 = scmp.lt.s32.totalorder %s260_s24, %s260_s24 }
  0x14   :  { %p267_p8 = por %p266_p7, %p265_p6 }
  0x16   :  { %p268_p9 = pnand %p267_p8, %p261_p5 }
  0x18   :  { %271 = shalt.err (!%p268_p9)
}
  0x19   :  { %45 = dma.hbm_to_vmem [thread:$0]  %s440_s1, 512, %s40_s23, [#allocation6], %s341_s18, %s341_s18, %s342_s19  }
  0x1a   :  { %332 = dma.done.wait [#allocation3], 512  }
  0x1b   :  { %333 = vsyncadd [#allocation3], 4294966784 }
  0x1c   :  { %334 = dma.done.wait [#allocation6], 512  }
  0x1d   :  { %335 = vsyncadd [#allocation6], 4294966784  ;;  %v378_v0 = vld [vmem:[#allocation2] sm:$0xff]  ;;  %v380_v1 = vld [vmem:[#allocation2 + $0x8] sm:$0xff]  ;;  %s344_s0 = smov [#allocation8]   ;;  %s345_s27 = smov [#allocation10]  }
  0x1e   :  { %v382_v2 = vld [vmem:[#allocation2 + $0x10] sm:$0xff]  ;;  %v384_v3 = vld [vmem:[#allocation2 + $0x18] sm:$0xff]  ;;  %v386_v4 = vld [vmem:[#allocation5] sm:$0xff]  ;;  %v75_v6 = vand.u32 2147483647, %v378_v0  ;;  %v71_v41 = vmax.f32 %v378_v0, 0.0 }
  0x1f   :  { %v388_v5 = vld [vmem:[#allocation5 + $0x8] sm:$0xff]  ;;  %v76_v8 = vand.u32 2147483647, %v380_v1  ;;  %v77_v9 = vand.u32 2147483647, %v382_v2  ;;  %v396_v11 = vld [vmem:[#allocation5 + $0x10] sm:$0xff] }
  0x20   :  { %v160_v7 = vadd.f32 %v388_v5, %v386_v4  ;;  %v78_v10 = vand.u32 2147483647, %v384_v3  ;;  %v79_v12 = vsub.f32 0.0, %v75_v6  ;;  %v399_v17 = vld [vmem:[#allocation5 + $0x18] sm:$0xff]  ;;  %v72_v45 = vmax.f32 %v380_v1, 0.0  ;;  %s181_s1 = sshll.u32 %s344_s0, 4  ;;  %s182_s1 = int_to_ptr.vmem [resolvable:$true] %s181_s1 }
  0x21   :  { %v80_v13 = vsub.f32 0.0, %v76_v8  ;;  %v81_v14 = vsub.f32 0.0, %v77_v9  ;;  %v73_v50 = vmax.f32 %v382_v2, 0.0  ;;  %v74_v55 = vmax.f32 %v384_v3, 0.0  ;;  %s191_s28 = sshll.u32 %s345_s27, 4  ;;  %s346_s29 = smov [#allocation7]   ;;  %s192_s28 = int_to_ptr.vmem [resolvable:$true] %s191_s28 }
  0x22   :  { %v82_v15 = vsub.f32 0.0, %v78_v10  ;;  %v161_v16 = vadd.f32 %v160_v7, %v396_v11  ;;  %v83_v18 = vmul.f32 1.442695, %v79_v12  ;;  %v139_v57 = vsub.f32 1.0, %v386_v4  ;;  %s171_s30 = sshll.u32 %s346_s29, 4  ;;  %s272_s5 = scalar_lea.vmem %s182_s1, 128  ;;  %s172_s30 = int_to_ptr.vmem [resolvable:$true] %s171_s30 }
  0x23   :  { %v85_v19 = vmul.f32 1.442695, %v80_v13  ;;  %v87_v20 = vmul.f32 1.442695, %v81_v14  ;;  %v140_v61 = vsub.f32 1.0, %v388_v5  ;;  %v141_v7 = vsub.f32 1.0, %v396_v11  ;;  %p273_p10 = scmp.ne.s32.totalorder %s182_s1, %s272_s5  ;;  %p277_p11 = scmp.lt.s32.totalorder %s182_s1, %s182_s1 }
  0x24   :  { %v89_v21 = vmul.f32 1.442695, %v82_v15  ;;  %v162_v22 = vadd.f32 %v161_v16, %v399_v17  ;;  %216 = vpow2.f32 %v83_v18  ;;  %v142_v13 = vsub.f32 1.0, %v399_v17  ;;  %p278_p12 = scmp.lt.s32.totalorder %s272_s5, %s272_s5 }
  0x25   :  { %218 = vpow2.f32 %v85_v19 }
  0x26   :  { %220 = vpow2.f32 %v87_v20  ;;  %164 = vst [vmem:[#allocation10] sm:$0xff] %v162_v22  ;;  %p279_p13 = por %p278_p12, %p277_p11 }
  0x27   :  { %222 = vpow2.f32 %v89_v21 }
  0x28   :  { %p280_p0 = pnand %p279_p13, %p273_p10 }
  0x31   :  { %v217_v23 = vpop.eup %216 }
  0x32   :  { %v219_v24 = vpop.eup %218  ;;  %v91_v25 = vadd.f32 1.0, %v217_v23  ;;  %v94_v31 = vmul.f32 -0.5, %v217_v23  ;;  %v97_v36 = vand.u32 2147483647, %v217_v23 }
  0x33   :  { %v221_v26 = vpop.eup %220  ;;  %v100_v27 = vadd.f32 1.0, %v219_v24  ;;  %v103_v32 = vmul.f32 -0.5, %v219_v24  ;;  %v106_v38 = vand.u32 2147483647, %v219_v24 }
  0x34   :  { %v223_v28 = vpop.eup %222  ;;  %224 = vlog2.f32 %v91_v25  ;;  %v109_v29 = vadd.f32 1.0, %v221_v26  ;;  %v112_v33 = vmul.f32 -0.5, %v221_v26  ;;  %v95_v34 = vadd.f32 1.0, %v94_v31 }
  0x35   :  { %226 = vlog2.f32 %v100_v27  ;;  %v118_v30 = vadd.f32 1.0, %v223_v28  ;;  %v121_v35 = vmul.f32 -0.5, %v223_v28  ;;  %v104_v37 = vadd.f32 1.0, %v103_v32 }
  0x36   :  { %228 = vlog2.f32 %v109_v29  ;;  %v113_v39 = vadd.f32 1.0, %v112_v33  ;;  %v115_v40 = vand.u32 2147483647, %v221_v26  ;;  %v96_v42 = vmul.f32 %v217_v23, %v95_v34 }
  0x37   :  { %230 = vlog2.f32 %v118_v30  ;;  %v122_v43 = vadd.f32 1.0, %v121_v35  ;;  %vm404_vm0 = vcmp.lt.f32.partialorder %v97_v36, 0.0004427343  ;;  %v105_v47 = vmul.f32 %v219_v24, %v104_v37 }
  0x38   :  { %v124_v48 = vand.u32 2147483647, %v223_v28  ;;  %vm409_vm1 = vcmp.lt.f32.partialorder %v106_v38, 0.0004427343  ;;  %v114_v53 = vmul.f32 %v221_v26, %v113_v39  ;;  %vm116_vm2 = vcmp.lt.f32.partialorder %v115_v40, 0.0004427343 }
  0x39   :  { %v123_v60 = vmul.f32 %v223_v28, %v122_v43 }
  0x3a   :  { %vm125_vm3 = vcmp.lt.f32.partialorder %v124_v48, 0.0004427343 }
  0x41   :  { %v225_v44 = vpop.eup %224 }
  0x42   :  { %v227_v49 = vpop.eup %226  ;;  %v93_v51 = vmul.f32 0.6931472, %v225_v44 }
  0x43   :  { %v229_v54 = vpop.eup %228  ;;  %v102_v56 = vmul.f32 0.6931472, %v227_v49 }
  0x44   :  { %v99_v58 = vsel %vm404_vm0, %v96_v42, %v93_v51  ;;  %v111_v59 = vmul.f32 0.6931472, %v229_v54  ;;  %v231_v62 = vpop.eup %230 }
  0x45   :  { %v108_v63 = vsel %vm409_vm1, %v105_v47, %v102_v56  ;;  %v127_v6 = vadd.f32 %v99_v58, %v71_v41  ;;  %v120_v9 = vmul.f32 0.6931472, %v231_v62 }
  0x46   :  { %v117_v8 = vsel %vm116_vm2, %v114_v53, %v111_v59  ;;  %v128_v10 = vadd.f32 %v108_v63, %v72_v45 }
  0x47   :  { %v129_v12 = vadd.f32 %v117_v8, %v73_v50  ;;  %v143_v14 = vmul.f32 %v139_v57, %v127_v6  ;;  %v131_v15 = vsub.f32 %v127_v6, %v378_v0  ;;  %v126_v16 = vsel %vm125_vm3, %v123_v60, %v120_v9 }
  0x48   :  { %v144_v18 = vmul.f32 %v140_v61, %v128_v10  ;;  %v132_v19 = vsub.f32 %v128_v10, %v380_v1  ;;  %v130_v20 = vadd.f32 %v126_v16, %v74_v55 }
  0x49   :  { %v145_v21 = vmul.f32 %v141_v7, %v129_v12  ;;  %v133_v22 = vsub.f32 %v129_v12, %v382_v2  ;;  %v135_v23 = vmul.f32 %v131_v15, %v386_v4 }
  0x4a   :  { %v154_v24 = vadd.f32 %v144_v18, %v143_v14  ;;  %v136_v25 = vmul.f32 %v132_v19, %v388_v5  ;;  %v146_v26 = vmul.f32 %v142_v13, %v130_v20  ;;  %v134_v27 = vsub.f32 %v130_v20, %v384_v3 }
  0x4b   :  { %v137_v28 = vmul.f32 %v133_v22, %v396_v11 }
  0x4c   :  { %v155_v29 = vadd.f32 %v154_v24, %v145_v21  ;;  %v148_v0 = vadd.f32 %v136_v25, %v135_v23  ;;  %v138_v30 = vmul.f32 %v134_v27, %v399_v17 }
  0x4e   :  { %v156_v1 = vadd.f32 %v155_v29, %v146_v26  ;;  %v149_v31 = vadd.f32 %v148_v0, %v137_v28 }
  0x50   :  { %v150_v2 = vadd.f32 %v149_v31, %v138_v30  ;;  %158 = vst [vmem:[#allocation8] sm:$0xff] %v156_v1 }
  0x51   :  { %283 = shalt.err (!%p280_p0)
}
  0x52   :  { %184 = dma.vmem_to_hbm [thread:$0]  %s182_s1, 128, %s442_s3, [#allocation9]   ;;  %152 = vst [vmem:[#allocation7] sm:$0xff] %v150_v2 }
  0x53   :  { %s292_s8 = scalar_lea.vmem %s192_s28, 128  ;;  %p297_p2 = scmp.lt.s32.totalorder %s192_s28, %s192_s28 }
  0x54   :  { %p293_p1 = scmp.ne.s32.totalorder %s192_s28, %s292_s8  ;;  %p298_p3 = scmp.lt.s32.totalorder %s292_s8, %s292_s8 }
  0x56   :  { %p299_p4 = por %p298_p3, %p297_p2 }
  0x58   :  { %p300_p5 = pnand %p299_p4, %p293_p1 }
  0x5a   :  { %303 = shalt.err (!%p300_p5)
}
  0x5b   :  { %194 = dma.vmem_to_hbm [thread:$0]  %s192_s28, 128, %s443_s4, [#allocation9]  }
  0x5c   :  { %s312_s11 = scalar_lea.vmem %s172_s30, 128  ;;  %p317_p7 = scmp.lt.s32.totalorder %s172_s30, %s172_s30 }
  0x5d   :  { %p313_p6 = scmp.ne.s32.totalorder %s172_s30, %s312_s11  ;;  %p318_p8 = scmp.lt.s32.totalorder %s312_s11, %s312_s11 }
  0x5f   :  { %p319_p9 = por %p318_p8, %p317_p7 }
  0x61   :  { %p320_p10 = pnand %p319_p9, %p313_p6 }
  0x63   :  { %323 = shalt.err (!%p320_p10)
}
  0x64   :  { %174 = dma.vmem_to_hbm [thread:$0]  %s172_s30, 128, %s441_s2, [#allocation4]  }
  0x65   :  { %336 = dma.done.wait [#allocation4], 128  }
  0x66   :  { %337 = vsyncadd [#allocation4], 4294967168 }
  0x67   :  { %338 = dma.done.wait [#allocation9], 256  }
  0x68   :  { %339 = vsyncadd [#allocation9], 4294967040 }
  0x69   :  { %204 = vsyncpa [#allocation3], 1 }
  0x6a   :  { %205 = vsyncpa [#allocation6], 1 }
  0x6b   :  { %206 = vsyncpa [#allocation4], 1 }
  0x6c   :  { %207 = vsyncpa [#allocation9], 1 }

</bundles_post_ra>
